<compile_context>
chip_gen: v7x
topology: tpu7x:2x2x1
jax: 0.10.0
libtpu: 0.0.40
codegen_flags: <defaults>
</compile_context>

<pallas_src>
import functools

import jax
import jax.numpy as jnp
from jax.experimental import pallas as pl
from jax.experimental.pallas import tpu as pltpu

IN_DIM = 28 * 28          # 784
H1_DIM = 128
H2_DIM = 64
OUT_DIM = 10
OUT_PAD = 128             # lane-dense fc3 output width
TILE_B_MAX = 512          # safe on v5e (16 MiB scoped), v6e (32 MiB), v7x (64 MiB phys)


def _round_up(x, m):
    return (x + m - 1) // m * m


def mlp_kernel(x_ref, w1_ref, b1_ref, w2_ref, b2_ref, w3_ref, b3_ref, o_ref):
    # x tile (TILE_B, 784) bf16; weights bf16 (resident); biases f32.
    x = x_ref[...]

    # fc1 + ReLU : bf16 MXU matmul, f32 accumulation, f32 epilogue.
    h1 = jnp.dot(x, w1_ref[...], preferred_element_type=jnp.float32)
    h1 = jnp.maximum(h1 + b1_ref[...], 0.0)                    # (TILE_B, 128) f32

    # fc2 + ReLU
    h2 = jnp.dot(h1.astype(jnp.bfloat16), w2_ref[...],
                 preferred_element_type=jnp.float32)
    h2 = jnp.maximum(h2 + b2_ref[...], 0.0)                    # (TILE_B, 64) f32

    # fc3 (padded to 128 lanes -> unmasked, lane-dense store)
    h3 = jnp.dot(h2.astype(jnp.bfloat16), w3_ref[...],
                 preferred_element_type=jnp.float32)
    o_ref[...] = (h3 + b3_ref[...]).astype(o_ref.dtype)        # (TILE_B, 128) f32


@functools.partial(jax.jit, static_argnames=())
def simple_nn_forward(x_nchw, params):
    """x_nchw: (B, 1, 28, 28) float32. Returns logits (B, 10) float32."""
    w1, b1, w2, b2, w3, b3 = params
    B = x_nchw.shape[0]

    # nn.Flatten() on NCHW -> (B, 784); cast activations/weights to bf16.
    x_flat = x_nchw.reshape(B, IN_DIM).astype(jnp.bfloat16)
    w1b = w1.astype(jnp.bfloat16)
    w2b = w2.astype(jnp.bfloat16)
    # Lane-dense fc3: zero-pad weight/bias columns 10..127.
    w3p = jnp.zeros((H2_DIM, OUT_PAD), jnp.bfloat16).at[:, :OUT_DIM].set(
        w3.astype(jnp.bfloat16))
    b3p = jnp.zeros((1, OUT_PAD), jnp.float32).at[:, :OUT_DIM].set(b3)

    # Batch tiling: small batches run as a single tile; large batches are
    # pipelined in TILE_B_MAX-row tiles with weights held resident in VMEM.
    tile_b = min(TILE_B_MAX, _round_up(B, 8))
    b_pad = _round_up(B, tile_b)
    if b_pad != B:
        x_flat = jnp.pad(x_flat, ((0, b_pad - B), (0, 0)))
    grid = (b_pad // tile_b,)

    flops = 2 * b_pad * (IN_DIM * H1_DIM + H1_DIM * H2_DIM + H2_DIM * OUT_PAD)
    bytes_accessed = (
        b_pad * IN_DIM * 2                                   # x (bf16)
        + (IN_DIM * H1_DIM + H1_DIM * H2_DIM + H2_DIM * OUT_PAD) * 2  # weights
        + (H1_DIM + H2_DIM + OUT_PAD) * 4                    # biases (f32)
        + b_pad * OUT_PAD * 4                                # output (f32)
    )

    out = pl.pallas_call(
        mlp_kernel,
        out_shape=jax.ShapeDtypeStruct((b_pad, OUT_PAD), jnp.float32),
        grid=grid,
        in_specs=[
            pl.BlockSpec((tile_b, IN_DIM), lambda i: (i, 0)),   # x tile
            pl.BlockSpec((IN_DIM, H1_DIM), lambda i: (0, 0)),   # w1 (resident)
            pl.BlockSpec((1, H1_DIM), lambda i: (0, 0)),        # b1
            pl.BlockSpec((H1_DIM, H2_DIM), lambda i: (0, 0)),   # w2
            pl.BlockSpec((1, H2_DIM), lambda i: (0, 0)),        # b2
            pl.BlockSpec((H2_DIM, OUT_PAD), lambda i: (0, 0)),  # w3 (padded)
            pl.BlockSpec((1, OUT_PAD), lambda i: (0, 0)),       # b3 (padded)
        ],
        out_specs=pl.BlockSpec((tile_b, OUT_PAD), lambda i: (i, 0)),
        compiler_params=pltpu.CompilerParams(
            dimension_semantics=("parallel",),
            vmem_limit_bytes=32 * 1024 * 1024,
        ),
        cost_estimate=pl.CostEstimate(
            flops=flops, transcendentals=0, bytes_accessed=bytes_accessed),
    )(x_flat, w1b, b1, w2b, b2, w3p, b3p)

    return out[:B, :OUT_DIM]


def init_params(key):
    """Deterministic init matching nn.Linear shapes (stored as (in, out))."""
    # TODO(synk): PyTorch's default init is kaiming_uniform(a=sqrt(5)); this
    # uses a simple uniform(+-1/sqrt(fan_in)) which is irrelevant to the
    # kernel's correctness.
    k1, k2, k3, k4, k5, k6 = jax.random.split(key, 6)

    def uniform(k, shape, fan_in):
        bound = 1.0 / jnp.sqrt(fan_in)
        return jax.random.uniform(k, shape, jnp.float32, -bound, bound)

    w1 = uniform(k1, (IN_DIM, H1_DIM), IN_DIM)
    b1 = uniform(k2, (1, H1_DIM), IN_DIM)
    w2 = uniform(k3, (H1_DIM, H2_DIM), H1_DIM)
    b2 = uniform(k4, (1, H2_DIM), H1_DIM)
    w3 = uniform(k5, (H2_DIM, OUT_DIM), H2_DIM)
    b3 = uniform(k6, (1, OUT_DIM), H2_DIM)
    return (w1, b1, w2, b2, w3, b3)


def reference_forward(x_nchw, params):
    """Pure-JAX reference mirroring the kernel's numerics (bf16 matmul
    operands, f32 accumulation + f32 epilogues)."""
    w1, b1, w2, b2, w3, b3 = params
    x = x_nchw.reshape(x_nchw.shape[0], -1).astype(jnp.bfloat16)
    h1 = jnp.dot(x, w1.astype(jnp.bfloat16),
                 preferred_element_type=jnp.float32)
    h1 = jnp.maximum(h1 + b1, 0.0)
    h2 = jnp.dot(h1.astype(jnp.bfloat16), w2.astype(jnp.bfloat16),
                 preferred_element_type=jnp.float32)
    h2 = jnp.maximum(h2 + b2, 0.0)
    h3 = jnp.dot(h2.astype(jnp.bfloat16), w3.astype(jnp.bfloat16),
                 preferred_element_type=jnp.float32)
    return h3 + b3


if __name__ == "__main__":
    key = jax.random.PRNGKey(0)
    kx, kp = jax.random.split(key)

    B = 8
    x = jax.random.normal(kx, (B, 1, 28, 28), jnp.float32)  # NCHW, like MNIST
    params = init_params(kp)

    logits = simple_nn_forward(x, params)
    logits = jax.block_until_ready(logits)

    ref = reference_forward(x, params)
    assert logits.shape == (B, OUT_DIM)
    assert jnp.allclose(logits, ref, atol=2e-3, rtol=2e-3), float(
        jnp.max(jnp.abs(logits - ref)))

    print("KERNEL_OK")
</pallas_src>

<mosaic_0001>
module attributes {stable_mosaic.version = 11 : i64} {
  func.func @mlp_kernel(%arg0: i32, %arg1: memref<8x784xbf16, #tpu.memory_space<vmem>>, %arg2: memref<784x128xbf16, #tpu.memory_space<vmem>>, %arg3: memref<1x128xf32, #tpu.memory_space<vmem>>, %arg4: memref<128x64xbf16, #tpu.memory_space<vmem>>, %arg5: memref<1x64xf32, #tpu.memory_space<vmem>>, %arg6: memref<64x128xbf16, #tpu.memory_space<vmem>>, %arg7: memref<1x128xf32, #tpu.memory_space<vmem>>, %arg8: memref<8x128xf32, #tpu.memory_space<vmem>>) attributes {dimension_semantics = [#tpu.dimension_semantics<parallel>], iteration_bounds = array<i64: 1>, scalar_prefetch = 0 : i64, scratch_operands = 0 : i64, tpu.core_type = #tpu.core_type<tc>, window_params = [{transform_indices = @transform_0, window_bounds = array<i64: 8, 784>}, {pipeline_mode = #tpu.pipeline_mode<synchronous>, transform_indices = @transform_1, window_bounds = array<i64: 784, 128>}, {pipeline_mode = #tpu.pipeline_mode<synchronous>, transform_indices = @transform_2, window_bounds = array<i64: 1, 128>}, {pipeline_mode = #tpu.pipeline_mode<synchronous>, transform_indices = @transform_3, window_bounds = array<i64: 128, 64>}, {pipeline_mode = #tpu.pipeline_mode<synchronous>, transform_indices = @transform_4, window_bounds = array<i64: 1, 64>}, {pipeline_mode = #tpu.pipeline_mode<synchronous>, transform_indices = @transform_5, window_bounds = array<i64: 64, 128>}, {pipeline_mode = #tpu.pipeline_mode<synchronous>, transform_indices = @transform_6, window_bounds = array<i64: 1, 128>}, {transform_indices = @transform_7, window_bounds = array<i64: 8, 128>}]} {
    %c0 = arith.constant 0 : index
    %c0_0 = arith.constant 0 : index
    %0 = vector.load %arg1[%c0, %c0_0] : memref<8x784xbf16, #tpu.memory_space<vmem>>, vector<8x784xbf16>
    %c0_1 = arith.constant 0 : index
    %c0_2 = arith.constant 0 : index
    %1 = vector.load %arg2[%c0_1, %c0_2] : memref<784x128xbf16, #tpu.memory_space<vmem>>, vector<784x128xbf16>
    %cst = arith.constant dense<0.000000e+00> : vector<8x128xf32>
    %2 = tpu.matmul %0, %1, %cst {dimension_numbers = #tpu.dot_dimension_numbers<[1], [0], [0], [1], [0, 0, 1, 1], [], []>} : vector<8x784xbf16>, vector<784x128xbf16>, vector<8x128xf32> -> vector<8x128xf32>
    %c0_3 = arith.constant 0 : index
    %c0_4 = arith.constant 0 : index
    %3 = vector.load %arg3[%c0_3, %c0_4] : memref<1x128xf32, #tpu.memory_space<vmem>>, vector<1x128xf32>
    %4 = vector.broadcast %3 : vector<1x128xf32> to vector<8x128xf32>
    %5 = arith.addf %2, %4 : vector<8x128xf32>
    %cst_5 = arith.constant 0.000000e+00 : f32
    %6 = vector.broadcast %cst_5 : f32 to vector<8x128xf32>
    %7 = arith.maximumf %5, %6 : vector<8x128xf32>
    %8 = arith.truncf %7 : vector<8x128xf32> to vector<8x128xbf16>
    %c0_6 = arith.constant 0 : index
    %c0_7 = arith.constant 0 : index
    %9 = vector.load %arg4[%c0_6, %c0_7] : memref<128x64xbf16, #tpu.memory_space<vmem>>, vector<128x64xbf16>
    %cst_8 = arith.constant dense<0.000000e+00> : vector<8x64xf32>
    %10 = tpu.matmul %8, %9, %cst_8 {dimension_numbers = #tpu.dot_dimension_numbers<[1], [0], [0], [1], [0, 0, 1, 1], [], []>} : vector<8x128xbf16>, vector<128x64xbf16>, vector<8x64xf32> -> vector<8x64xf32>
    %c0_9 = arith.constant 0 : index
    %c0_10 = arith.constant 0 : index
    %11 = vector.load %arg5[%c0_9, %c0_10] : memref<1x64xf32, #tpu.memory_space<vmem>>, vector<1x64xf32>
    %12 = vector.broadcast %11 : vector<1x64xf32> to vector<8x64xf32>
    %13 = arith.addf %10, %12 : vector<8x64xf32>
    %cst_11 = arith.constant 0.000000e+00 : f32
    %14 = vector.broadcast %cst_11 : f32 to vector<8x64xf32>
    %15 = arith.maximumf %13, %14 : vector<8x64xf32>
    %16 = arith.truncf %15 : vector<8x64xf32> to vector<8x64xbf16>
    %c0_12 = arith.constant 0 : index
    %c0_13 = arith.constant 0 : index
    %17 = vector.load %arg6[%c0_12, %c0_13] : memref<64x128xbf16, #tpu.memory_space<vmem>>, vector<64x128xbf16>
    %cst_14 = arith.constant dense<0.000000e+00> : vector<8x128xf32>
    %18 = tpu.matmul %16, %17, %cst_14 {dimension_numbers = #tpu.dot_dimension_numbers<[1], [0], [0], [1], [0, 0, 1, 1], [], []>} : vector<8x64xbf16>, vector<64x128xbf16>, vector<8x128xf32> -> vector<8x128xf32>
    %c0_15 = arith.constant 0 : index
    %c0_16 = arith.constant 0 : index
    %19 = vector.load %arg7[%c0_15, %c0_16] : memref<1x128xf32, #tpu.memory_space<vmem>>, vector<1x128xf32>
    %20 = vector.broadcast %19 : vector<1x128xf32> to vector<8x128xf32>
    %21 = arith.addf %18, %20 : vector<8x128xf32>
    %c0_17 = arith.constant 0 : index
    %c0_18 = arith.constant 0 : index
    %22 = vector.load %arg8[%c0_17, %c0_18] : memref<8x128xf32, #tpu.memory_space<vmem>>, vector<8x128xf32>
    tpu.vector_store %arg8[%c0_17, %c0_18], %21 {strides = array<i32>} : memref<8x128xf32, #tpu.memory_space<vmem>>, vector<8x128xf32>,
    return
  }
  func.func @transform_0(%arg0: i32) -> (i32, i32) {
    %c0_i32 = arith.constant 0 : i32
    %c0_i32_0 = arith.constant 0 : i32
    return %arg0, %c0_i32 : i32, i32
  }
  func.func @transform_1(%arg0: i32) -> (i32, i32) {
    %c0_i32 = arith.constant 0 : i32
    %c0_i32_0 = arith.constant 0 : i32
    %c0_i32_1 = arith.constant 0 : i32
    return %c0_i32, %c0_i32_0 : i32, i32
  }
  func.func @transform_2(%arg0: i32) -> (i32, i32) {
    %c0_i32 = arith.constant 0 : i32
    %c0_i32_0 = arith.constant 0 : i32
    %c0_i32_1 = arith.constant 0 : i32
    return %c0_i32, %c0_i32_0 : i32, i32
  }
  func.func @transform_3(%arg0: i32) -> (i32, i32) {
    %c0_i32 = arith.constant 0 : i32
    %c0_i32_0 = arith.constant 0 : i32
    %c0_i32_1 = arith.constant 0 : i32
    return %c0_i32, %c0_i32_0 : i32, i32
  }
  func.func @transform_4(%arg0: i32) -> (i32, i32) {
    %c0_i32 = arith.constant 0 : i32
    %c0_i32_0 = arith.constant 0 : i32
    %c0_i32_1 = arith.constant 0 : i32
    return %c0_i32, %c0_i32_0 : i32, i32
  }
  func.func @transform_5(%arg0: i32) -> (i32, i32) {
    %c0_i32 = arith.constant 0 : i32
    %c0_i32_0 = arith.constant 0 : i32
    %c0_i32_1 = arith.constant 0 : i32
    return %c0_i32, %c0_i32_0 : i32, i32
  }
  func.func @transform_6(%arg0: i32) -> (i32, i32) {
    %c0_i32 = arith.constant 0 : i32
    %c0_i32_0 = arith.constant 0 : i32
    %c0_i32_1 = arith.constant 0 : i32
    return %c0_i32, %c0_i32_0 : i32, i32
  }
  func.func @transform_7(%arg0: i32) -> (i32, i32) {
    %c0_i32 = arith.constant 0 : i32
    %c0_i32_0 = arith.constant 0 : i32
    return %arg0, %c0_i32 : i32, i32
  }
}

</mosaic_0001>

<bundles_post_ra>
// kernel: simple_nn_forward.1
= control target key start
LH: loop header
LB: loop body
LE: loop exit
PB: predicated region body
PF: predicated region fallthrough
CT: control target
= control target key end

     0   :  { %v1120_v43 = vmov 0.0   ;;  %vm1121_vm0 = vmmov 0   ;;  %vm455_vm1 = vcmask 130048   ;;  %s1398_s0 = inlined_call_operand.vmem [shape: bf16[8,784], index: 0, kind: input, shape index: {}]   ;;  %s1399_s1 = inlined_call_operand.vmem [shape: bf16[784,128], index: 1, kind: input, shape index: {}]   ;;  %s1400_s2 = inlined_call_operand.vmem [shape: f32[1,128], index: 2, kind: input, shape index: {}]   ;;  %s1401_s3 = inlined_call_operand.vmem [shape: bf16[128,64], index: 3, kind: input, shape index: {}]   ;;  %s1402_s4 = inlined_call_operand.vmem [shape: f32[1,64], index: 4, kind: input, shape index: {}]   ;;  %s1403_s5 = inlined_call_operand.vmem [shape: bf16[64,128], index: 5, kind: input, shape index: {}]   ;;  %s1404_s6 = inlined_call_operand.vmem [shape: f32[1,128], index: 6, kind: input, shape index: {}]   ;;  %s1405_s7 = inlined_call_operand.hbm [shape: f32[8,128], index: 7, kind: output, shape index: {}]  }
   0x1   :  { %v1028_v0 = vld [vmem:[%s1399_s1 + $0x40] sm:$0xff]   ;;  %v1032_v4 = vld [vmem:[%s1399_s1 + $0x48] sm:$0xff]   ;;  %v1036_v8 = vld [vmem:[%s1399_s1 + $0x50] sm:$0xff]  }
   0x2   :  { %v1029_v1 = vld [vmem:[%s1399_s1] sm:$0xff]   ;;  %905 = vmatprep.subr.bf16.mxu0 %v1028_v0  ;;  %v1033_v5 = vld [vmem:[%s1399_s1 + $0x8] sm:$0xff]   ;;  %v1037_v9 = vld [vmem:[%s1399_s1 + $0x10] sm:$0xff]  }
   0x3   :  { %v1030_v2 = vld [vmem:[%s1399_s1 + $0xc0] sm:$0xff]   ;;  %906 = vmatpush3.bf16.msra.mxu0 %v1029_v1  ;;  %v1034_v6 = vld [vmem:[%s1399_s1 + $0xc8] sm:$0xff]   ;;  %v1038_v10 = vld [vmem:[%s1399_s1 + $0xd0] sm:$0xff]  }
   0x4   :  { %v1031_v3 = vld [vmem:[%s1399_s1 + $0x80] sm:$0xff]   ;;  %927 = vmatprep.subr.bf16.mxu1 %v1030_v2  ;;  %907 = vmatprep.subr.bf16.mxu0 %v1032_v4  ;;  %v1035_v7 = vld [vmem:[%s1399_s1 + $0x88] sm:$0xff]   ;;  %v1039_v11 = vld [vmem:[%s1399_s1 + $0x90] sm:$0xff]  }
   0x5   :  { %928 = vmatpush3.bf16.msra.mxu1 %v1031_v3  ;;  %v1040_v12 = vld [vmem:[%s1399_s1 + $0x58] sm:$0xff]   ;;  %v1044_v16 = vld [vmem:[%s1399_s1 + $0x60] sm:$0xff]   ;;  %v1048_v20 = vld [vmem:[%s1399_s1 + $0x68] sm:$0xff]  }
   0x6   :  { %929 = vmatprep.subr.bf16.mxu1 %v1034_v6  ;;  %v1041_v13 = vld [vmem:[%s1399_s1 + $0x18] sm:$0xff]   ;;  %v1045_v17 = vld [vmem:[%s1399_s1 + $0x20] sm:$0xff]   ;;  %v1049_v21 = vld [vmem:[%s1399_s1 + $0x28] sm:$0xff]  }
   0x7   :  { %908 = vmatpush3.bf16.msra.mxu0 %v1033_v5  ;;  %v1042_v14 = vld [vmem:[%s1399_s1 + $0xd8] sm:$0xff]   ;;  %v1046_v18 = vld [vmem:[%s1399_s1 + $0xe0] sm:$0xff]   ;;  %v1050_v22 = vld [vmem:[%s1399_s1 + $0xe8] sm:$0xff]  }
   0x8   :  { %909 = vmatprep.subr.bf16.mxu0 %v1036_v8  ;;  %v1043_v15 = vld [vmem:[%s1399_s1 + $0x98] sm:$0xff]   ;;  %v1047_v19 = vld [vmem:[%s1399_s1 + $0xa0] sm:$0xff]   ;;  %v1051_v23 = vld [vmem:[%s1399_s1 + $0xa8] sm:$0xff]  }
   0x9   :  { %930 = vmatpush3.bf16.msra.mxu1 %v1035_v7  ;;  %v1052_v24 = vld [vmem:[%s1399_s1 + $0x70] sm:$0xff]   ;;  %v1056_v28 = vld [vmem:[%s1399_s1 + $0x78] sm:$0xff]   ;;  %v28_v31 = vld [vmem:[%s1398_s0] sm:$0xff] }
   0xa   :  { %931 = vmatprep.subr.bf16.mxu1 %v1038_v10  ;;  %v1053_v25 = vld [vmem:[%s1399_s1 + $0x30] sm:$0xff]   ;;  %v1057_v29 = vld [vmem:[%s1399_s1 + $0x38] sm:$0xff]   ;;  %v833_v32 = vcombine.low %v28_v31, %v28_v31  ;;  %v834_v33 = vcombine.high %v28_v31, %v28_v31  ;;  %v1062_v35 = vld [vmem:[%s1399_s1 + $0x140] sm:$0xff]  }
   0xb   :  { %910 = vmatpush3.bf16.msra.mxu0 %v1037_v9  ;;  %v1054_v26 = vld [vmem:[%s1399_s1 + $0xf0] sm:$0xff]   ;;  %v1058_v30 = vld [vmem:[%s1399_s1 + $0xf8] sm:$0xff]   ;;  %v29_v36 = vld [vmem:[%s1398_s0 + $0x8] sm:$0xff] }
   0xc   :  { %911 = vmatprep.subr.bf16.mxu0 %v1040_v12  ;;  %v1055_v27 = vld [vmem:[%s1399_s1 + $0xb0] sm:$0xff]   ;;  %v1061_v34 = vld [vmem:[%s1399_s1 + $0xb8] sm:$0xff]   ;;  %491 = vmatprep.mubr.bf16.mxu0 %v834_v33  ;;  %v835_v37 = vcombine.low %v29_v36, %v29_v36  ;;  %v836_v38 = vcombine.high %v29_v36, %v29_v36  ;;  %v1065_v39 = vld [vmem:[%s1399_s1 + $0x100] sm:$0xff]  }
   0xd   :  { %932 = vmatpush3.bf16.msra.mxu1 %v1039_v11  ;;  %v1066_v40 = vld [vmem:[%s1399_s1 + $0x148] sm:$0xff]   ;;  %v1068_v42 = vld [vmem:[%s1399_s1 + $0x150] sm:$0xff]   ;;  %v1070_v45 = vld [vmem:[%s1399_s1 + $0x158] sm:$0xff]  }
   0xe   :  { %933 = vmatprep.subr.bf16.mxu1 %v1042_v14  ;;  %531 = vmatprep.mubr.bf16.mxu1 %v836_v38  ;;  %v1067_v41 = vld [vmem:[%s1399_s1 + $0x108] sm:$0xff]   ;;  %v1069_v44 = vld [vmem:[%s1399_s1 + $0x110] sm:$0xff]   ;;  %v1071_v46 = vld [vmem:[%s1399_s1 + $0x118] sm:$0xff]  }
   0xf   :  { %912 = vmatpush3.bf16.msra.mxu0 %v1041_v13  ;;  %v1072_v47 = vld [vmem:[%s1399_s1 + $0x160] sm:$0xff]   ;;  %v1074_v49 = vld [vmem:[%s1399_s1 + $0x168] sm:$0xff]   ;;  %v30_v51 = vld [vmem:[%s1398_s0 + $0x10] sm:$0xff] }
  0x10   :  { %913 = vmatprep.subr.bf16.mxu0 %v1044_v16  ;;  %v1073_v48 = vld [vmem:[%s1399_s1 + $0x120] sm:$0xff]   ;;  %v1075_v52 = vld [vmem:[%s1399_s1 + $0x128] sm:$0xff]   ;;  %v838_v53 = vcombine.high %v30_v51, %v30_v51  ;;  %v1083_v54 = vld [vmem:[%s1398_s0 + $0x18] ss:$0 sps:$4 sm:$0xff]  }
  0x11   :  { %934 = vmatpush3.bf16.msra.mxu1 %v1043_v15  ;;  %v1080_v50 = vld [vmem:[%s1399_s1 + $0x180] sm:$0xff]   ;;  %v1076_v55 = vld [vmem:[%s1399_s1 + $0x170] sm:$0xff]   ;;  %v1078_v57 = vld [vmem:[%s1399_s1 + $0x178] sm:$0xff]  }
  0x12   :  { %935 = vmatprep.subr.bf16.mxu1 %v1046_v18  ;;  %v1077_v56 = vld [vmem:[%s1399_s1 + $0x130] sm:$0xff]  }
  0x13   :  { %914 = vmatpush3.bf16.msra.mxu0 %v1045_v17 }
  0x14   :  { %915 = vmatprep.subr.bf16.mxu0 %v1048_v20 }
  0x15   :  { %936 = vmatpush3.bf16.msra.mxu1 %v1047_v19 }
  0x16   :  { %937 = vmatprep.subr.bf16.mxu1 %v1050_v22 }
  0x17   :  { %916 = vmatpush3.bf16.msra.mxu0 %v1049_v21 }
  0x18   :  { %917 = vmatprep.subr.bf16.mxu0 %v1052_v24 }
  0x19   :  { %938 = vmatpush3.bf16.msra.mxu1 %v1051_v23 }
  0x1a   :  { %939 = vmatprep.subr.bf16.mxu1 %v1054_v26 }
  0x1b   :  { %918 = vmatpush3.bf16.msra.mxu0 %v1053_v25 }
  0x1c   :  { %919 = vmatprep.subr.bf16.mxu0 %v1056_v28 }
  0x1d   :  { %940 = vmatpush3.bf16.msra.mxu1 %v1055_v27 }
  0x1e   :  { %941 = vmatprep.subr.bf16.mxu1 %v1058_v30 }
  0x1f   :  { %920 = vmatpush3.bf16.msra.mxu0 %v1057_v29 }
  0x20   :  { %949 = vmatprep.subr.bf16.mxu0 %v1062_v35 }
  0x21   :  { %942 = vmatpush3.bf16.msra.mxu1 %v1061_v34 }
  0x22   :  { %492 = vmatmul.mubr.bf16.vlgmr.msra.gmra.mrb[0].mxu0 %v833_v32  ;;  %987 = vmatprep.subr.bf16.mxu1 %v1120_v43 }
  0x23   :  { %950 = vmatpush3.bf16.msra.mxu0 %v1065_v39  ;;  %571 = vmatprep.mubr.bf16.mxu0 %v838_v53 }
  0x24   :  { %532 = vmatmul.mubr.bf16.vlgmr.msra.gmra.mrb[0].mxu1 %v835_v37  ;;  %951 = vmatprep.subr.bf16.mxu0 %v1066_v40 }
  0x25   :  { %989 = vmatprep.mubr.msk.bf16.mxu1 %vm1121_vm0, %v1120_v43  ;;  %988 = vmatpush3.bf16.msra.mxu1 %v1080_v50 }
  0x26   :  { %993 = vmatprep.subr.bf16.mxu1 %v1120_v43 }
  0x27   :  { %952 = vmatpush3.bf16.msra.mxu0 %v1067_v41 }
  0x28   :  { %953 = vmatprep.subr.bf16.mxu0 %v1068_v42 }
  0x2b   :  { %954 = vmatpush3.bf16.msra.mxu0 %v1069_v44 }
  0x2c   :  { %955 = vmatprep.subr.bf16.mxu0 %v1070_v45  ;;  %990 = vmatmul.mubr.msk.bf16.vlgmr.msra.gmra.mrb[4].mxu1 %vm455_vm1, %v1083_v54 }
  0x2d   :  { %1009 = vmatprep.mubr.msk.bf16.mxu1 %vm1121_vm0, %v1120_v43 }
  0x2f   :  { %956 = vmatpush3.bf16.msra.mxu0 %v1071_v46 }
  0x30   :  { %957 = vmatprep.subr.bf16.mxu0 %v1072_v47 }
  0x33   :  { %958 = vmatpush3.bf16.msra.mxu0 %v1073_v48 }
  0x34   :  { %959 = vmatprep.subr.bf16.mxu0 %v1074_v49 }
  0x37   :  { %960 = vmatpush3.bf16.msra.mxu0 %v1075_v52 }
  0x38   :  { %961 = vmatprep.subr.bf16.mxu0 %v1076_v55 }
  0x39   :  { %12 = vsyncpa [#allocation3], 0  ;;  %v1079_v58 = vld [vmem:[%s1399_s1 + $0x138] sm:$0xff]   ;;  %v837_v59 = vcombine.low %v30_v51, %v30_v51  ;;  %v1084_v60 = vld [vmem:[%s1401_s3] sm:$0xff]   ;;  %vm773_vm2 = vcmask 523264   ;;  %s1122_s17 = smov [#allocation2]  }
  0x3a   :  { %994 = vmatpush3.bf16.msra.mxu1 %v1084_v60  ;;  %v1085_v61 = vld [vmem:[%s1401_s3 + $0x8] sm:$0xff]   ;;  %v1086_v62 = vld [vmem:[%s1401_s3 + $0x10] sm:$0xff]   ;;  %v1087_v63 = vld [vmem:[%s1401_s3 + $0x18] sm:$0xff]  }
  0x3b   :  { %962 = vmatpush3.bf16.msra.mxu0 %v1077_v56  ;;  %995 = vmatprep.subr.bf16.mxu1 %v1120_v43  ;;  %v1088_v0 = vld [vmem:[%s1401_s3 + $0x20] sm:$0xff]   ;;  %v1089_v1 = vld [vmem:[%s1401_s3 + $0x28] sm:$0xff]   ;;  %v1090_v2 = vld [vmem:[%s1401_s3 + $0x30] sm:$0xff]  }
  0x3c   :  { %963 = vmatprep.subr.bf16.mxu0 %v1078_v57  ;;  %v1091_v3 = vld [vmem:[%s1401_s3 + $0x38] sm:$0xff]   ;;  %v1092_v4 = vld [vmem:[%s1403_s5] sm:$0xff]   ;;  %v1093_v5 = vld [vmem:[%s1403_s5 + $0x8] sm:$0xff]  }
  0x3d   :  { %v832_v7 = vld [vmem:[%s1400_s2] ss:$0 sm:$0xff]  ;;  %v1094_v32 = vld [vmem:[%s1403_s5 + $0x10] sm:$0xff]   ;;  %v1095_v33 = vld [vmem:[%s1403_s5 + $0x18] sm:$0xff]   ;;  %s824_s5 = sshll.u32 %s1122_s17, 4  ;;  %s825_s5 = int_to_ptr.vmem [resolvable:$true] %s824_s5 }
  0x3e   :  { %996 = vmatpush3.bf16.msra.mxu1 %v1085_v61  ;;  %v890_v34 = vld [vmem:[%s1402_s4] ss:$0 sm:$0xff]  ;;  %s1096_s4 = scalar_lea.vmem %s825_s5, 128  ;;  %p1101_p1 = scmp.lt.s32.totalorder %s825_s5, %s825_s5 }
  0x3f   :  { %964 = vmatpush3.bf16.msra.mxu0 %v1079_v58  ;;  %997 = vmatprep.subr.bf16.mxu1 %v1120_v43  ;;  %v899_v42 = vld [vmem:[%s1404_s6] ss:$0 sm:$0xff]  ;;  %p1097_p0 = scmp.ne.s32.totalorder %s825_s5, %s1096_s4  ;;  %p1102_p2 = scmp.lt.s32.totalorder %s1096_s4, %s1096_s4 }
  0x40   :  { %1013 = vmatprep.subr.bf16.mxu0 %v1120_v43 }
  0x41   :  { %p1103_p3 = por %p1102_p2, %p1101_p1 }
  0x42   :  { %572 = vmatmul.mubr.bf16.vlgmr.msra.gmra.mrb[4].mxu0 %v837_v59  ;;  %998 = vmatpush3.bf16.msra.mxu1 %v1086_v62 }
  0x43   :  { %1021 = vmatprep.mubr.msk.bf16.mxu0 %vm1121_vm0, %v1120_v43  ;;  %999 = vmatprep.subr.bf16.mxu1 %v1120_v43  ;;  %p1104_p4 = pnand %p1103_p3, %p1097_p0 }
  0x44   :  { %1014 = vmatpush3.bf16.msra.mxu0 %v1092_v4 }
  0x45   :  { %1015 = vmatprep.subr.bf16.mxu0 %v1120_v43 }
  0x46   :  { %1000 = vmatpush3.bf16.msra.mxu1 %v1087_v63 }
  0x47   :  { %1001 = vmatprep.subr.bf16.mxu1 %v1120_v43 }
  0x48   :  { %1016 = vmatpush3.bf16.msra.mxu0 %v1093_v5 }
  0x49   :  { %1017 = vmatprep.subr.bf16.mxu0 %v1120_v43 }
  0x4a   :  { %1002 = vmatpush3.bf16.msra.mxu1 %v1088_v0 }
  0x4b   :  { %1003 = vmatprep.subr.bf16.mxu1 %v1120_v43 }
  0x4c   :  { %1018 = vmatpush3.bf16.msra.mxu0 %v1094_v32 }
  0x4d   :  { %1019 = vmatprep.subr.bf16.mxu0 %v1120_v43 }
  0x4e   :  { %1004 = vmatpush3.bf16.msra.mxu1 %v1089_v1 }
  0x4f   :  { %1005 = vmatprep.subr.bf16.mxu1 %v1120_v43 }
  0x50   :  { %1020 = vmatpush3.bf16.msra.mxu0 %v1095_v33 }
  0x52   :  { %1006 = vmatpush3.bf16.msra.mxu1 %v1090_v2 }
  0x53   :  { %1007 = vmatprep.subr.bf16.mxu1 %v1120_v43 }
  0x56   :  { %1008 = vmatpush3.bf16.msra.mxu1 %v1091_v3 }
  0xf5   :  { %v921_v6 = vpop.f32.mrb[0].mxu0 }
  0xf6   :  { %v922_v8 = vpop.f32.mrb[1].mxu0 }
  0xf7   :  { %v923_v9 = vadd.f32 %v922_v8, %v921_v6  ;;  %v924_v10 = vpop.f32.mrb[2].mxu0  ;;  %v943_v11 = vpop.f32.mrb[0].mxu1 }
  0xf8   :  { %v925_v12 = vpop.f32.mrb[3].mxu0  ;;  %v944_v13 = vpop.f32.mrb[1].mxu1 }
  0xf9   :  { %v494_v14 = vadd.f32 %v923_v9, %v832_v7  ;;  %v945_v15 = vadd.f32 %v944_v13, %v943_v11  ;;  %v946_v16 = vpop.f32.mrb[2].mxu1 }
  0xfa   :  { %v947_v17 = vpop.f32.mrb[3].mxu1 }
  0xfb   :  { %v534_v18 = vadd.f32 %v945_v15, %v494_v14 }
  0xff   :  { %v613_v19 = vpop.f32.mrb[4].mxu1 }
 0x100   :  { %v991_v20 = vpop.f32.mrb[5].mxu1 }
 0x101   :  { %v616_v21 = vpop.f32.mrb[6].mxu1 }
 0x102   :  { %v992_v22 = vpop.f32.mrb[7].mxu1 }
 0x115   :  { %v965_v23 = vpop.f32.mrb[4].mxu0 }
 0x116   :  { %v966_v24 = vpop.f32.mrb[5].mxu0 }
 0x117   :  { %v967_v25 = vadd.f32 %v966_v24, %v965_v23  ;;  %v968_v26 = vpop.f32.mrb[6].mxu0 }
 0x118   :  { %v969_v27 = vpop.f32.mrb[7].mxu0 }
 0x119   :  { %v574_v28 = vadd.f32 %v967_v25, %v534_v18 }
 0x11b   :  { %v614_v29 = vadd.f32 %v613_v19, %v574_v28 }
 0x11d   :  { %v619_v30 = vmax.f32 %v614_v29, 0.0 }
 0x11f   :  { %v620_v31 = vpack.c.bf16 %v619_v30, %v619_v30 }
 0x121   :  { %1010 = vmatmul.mubr.bf16.vlgmr.msra.gmra.mrb[8].mxu1 %v620_v31 }
 0x1f4   :  { %v726_v35 = vpop.f32.mrb[8].mxu1 }
 0x1f5   :  { %v727_v36 = vadd.f32 %v890_v34, %v726_v35  ;;  %v1011_v37 = vpop.f32.mrb[9].mxu1 }
 0x1f6   :  { %v729_v38 = vpop.f32.mrb[10].mxu1 }
 0x1f7   :  { %v732_v39 = vmax.f32 %v727_v36, 0.0  ;;  %v1012_v40 = vpop.f32.mrb[11].mxu1 }
 0x1f9   :  { %v733_v41 = vpack.c.bf16 %v732_v39, %v732_v39 }
 0x1fb   :  { %1022 = vmatmul.mubr.msk.bf16.vlgmr.msra.gmra.mrb[8].mxu0 %vm773_vm2, %v733_v41 }
 0x2ce   :  { %v811_v43 = vpop.f32.mrb[8].mxu0 }
 0x2cf   :  { %v812_v44 = vadd.f32 %v899_v42, %v811_v43  ;;  %v1023_v45 = vpop.f32.mrb[9].mxu0 }
 0x2d0   :  { %v814_v46 = vpop.f32.mrb[10].mxu0 }
 0x2d1   :  { %817 = vst [vmem:[#allocation2] sm:$0xff] %v812_v44  ;;  %v1024_v47 = vpop.f32.mrb[11].mxu0 }
 0x2d2   :  { %1107 = shalt.err (!%p1104_p4)
}
 0x2d3   :  { %s1108_s6 = scalar_lea.hbm %s1405_s7, 128 }
 0x2d4   :  { %p1109_p5 = scmp.ne.s32.totalorder %s1405_s7, %s1108_s6  ;;  %p1112_p6 = scmp.lt.u32.totalorder %s1108_s6, %s1405_s7 }
 0x2d6   :  { %p1114_p7 = pnand %p1112_p6, %p1109_p5 }
 0x2d8   :  { %1117 = shalt.err (!%p1114_p7)
}
 0x2d9   :  { %827 = dma.vmem_to_hbm [thread:$0]  %s825_s5, 128, %s1405_s7, [#allocation3]  }
 0x2da   :  { %1118 = dma.done.wait [#allocation3], 128  }
 0x2db   :  { %1119 = vsyncadd [#allocation3], 4294967168 }
 0x2dc   :  { %831 = vsyncpa [#allocation3], 1 }

</bundles_post_ra>
